<compile_context>
chip_gen: v5e
topology: v5e:2x2
jax: 0.10.0
libtpu: 0.0.40
codegen_flags: <defaults>
</compile_context>

<pallas_src>
import jax
import jax.numpy as jnp
from jax.experimental import pallas as pl
from jax.experimental.pallas import tpu as pltpu

LANE = 128
_SUBLANE = 8
_DEFAULT_TM = 1024                 # requested rows per grid step (tunable)
_VMEM_BUDGET = 12 * 1024 * 1024    # conservative: fits every generation's default scoped VMEM


def _round_up(x, m):
    return (x + m - 1) // m * m


def _cbl_kernel(x_ref, w_ref, b_ref, o_ref):
    # x: (TM, Kp); w: (Kp, Cp) with BN scale pre-folded; b: (1, Cp) f32.
    y = jnp.dot(x_ref[...], w_ref[...], preferred_element_type=jnp.float32)
    y = y + b_ref[...]                       # folded BatchNorm shift
    y = jnp.where(y >= 0, y, 0.1 * y)        # LeakyReLU(0.1)
    o_ref[...] = y.astype(o_ref.dtype)


def _maybe_pad2d(a, rows, cols):
    if rows == 0 and cols == 0:
        return a
    return jnp.pad(a, ((0, rows), (0, cols)))


def _cbl_matmul(x_cols, w_folded, bias, *, out_dtype, tm_req=_DEFAULT_TM,
                vmem_budget=_VMEM_BUDGET):
    """LeakyReLU((M,K) @ (K,Cout) + bias) as a padded / row-tiled Pallas matmul."""
    M, K = x_cols.shape
    Cout = w_folded.shape[1]
    cdt = x_cols.dtype

    Kp = _round_up(max(K, 1), LANE)          # full-width MXU contraction
    Cp = _round_up(max(Cout, 1), LANE)       # lane-dense output stores

    in_b = jnp.dtype(cdt).itemsize
    out_b = jnp.dtype(out_dtype).itemsize
    # Double-buffered input/output tiles + (conservatively doubled) weight/bias.
    fixed = 2 * Kp * Cp * in_b + 2 * Cp * 4
    per_row = 2 * (Kp * in_b + Cp * out_b)
    tm_cap = max(_SUBLANE, (vmem_budget - fixed) // per_row)
    # Keep at least 2 grid steps when possible so megacore can shard the row axis.
    tm = min(tm_req, tm_cap, _round_up(-(-M // 2), _SUBLANE))
    tm = max(_SUBLANE, (tm // _SUBLANE) * _SUBLANE)

    Mp = _round_up(M, tm)
    x_p = _maybe_pad2d(x_cols, Mp - M, Kp - K)
    w_p = _maybe_pad2d(w_folded.astype(cdt), Kp - K, Cp - Cout)
    b_p = _maybe_pad2d(bias.astype(jnp.float32).reshape(1, Cout), 0, Cp - Cout)

    out = pl.pallas_call(
        _cbl_kernel,
        out_shape=jax.ShapeDtypeStruct((Mp, Cp), out_dtype),
        grid_spec=pltpu.PrefetchScalarGridSpec(
            num_scalar_prefetch=0,
            grid=(Mp // tm,),
            in_specs=[
                pl.BlockSpec((tm, Kp), lambda i: (i, 0)),
                pl.BlockSpec((Kp, Cp), lambda i: (0, 0)),
                pl.BlockSpec((1, Cp), lambda i: (0, 0)),
            ],
            out_specs=pl.BlockSpec((tm, Cp), lambda i: (i, 0)),
        ),
        compiler_params=pltpu.CompilerParams(
            dimension_semantics=("parallel",)),
    )(x_p, w_p, b_p)
    return out[:M, :Cout]


def _im2col_nhwc(x_nhwc, k, stride):
    """kxk / stride patches with pad=k//2. Returns ((N*Ho*Wo, k*k*C), Ho, Wo)."""
    N, H, W, C = x_nhwc.shape
    pad = k // 2
    if pad:
        x_nhwc = jnp.pad(x_nhwc, ((0, 0), (pad, pad), (pad, pad), (0, 0)))
    Ho = (H + 2 * pad - k) // stride + 1
    Wo = (W + 2 * pad - k) // stride + 1
    if k == 1:
        cols = x_nhwc[:, ::stride, ::stride, :]
        return cols.reshape(N * Ho * Wo, C), Ho, Wo
    taps = []
    for dy in range(k):
        for dx in range(k):
            taps.append(x_nhwc[:, dy:dy + stride * (Ho - 1) + 1:stride,
                               dx:dx + stride * (Wo - 1) + 1:stride, :])
    cols = jnp.stack(taps, axis=3)           # (N, Ho, Wo, k*k, C): tap-major, channel-minor
    return cols.reshape(N * Ho * Wo, k * k * C), Ho, Wo


def cbl_forward_nhwc(x_nhwc, conv_w, bn_gamma, bn_beta, bn_mean, bn_var, *,
                     stride=1, eps=1e-5, compute_dtype=None, out_dtype=None,
                     tm=_DEFAULT_TM):
    """CBL forward on an NHWC tensor; returns NHWC. conv_w is PyTorch (Cout,Cin,k,k)."""
    N, H, W, Cin = x_nhwc.shape
    Cout, Cin_w, kh, kw = conv_w.shape
    assert Cin_w == Cin and kh == kw, "expect square kernel matching input channels"
    k = kh
    if compute_dtype is None:
        compute_dtype = x_nhwc.dtype
    if out_dtype is None:
        out_dtype = x_nhwc.dtype

    # TODO(synk): BatchNorm2d training-mode batch statistics are not implemented;
    # eval-mode running stats are folded into the conv weight and a per-channel bias.
    scale = bn_gamma / jnp.sqrt(bn_var + eps)            # (Cout,)
    bias = bn_beta - bn_mean * scale                     # (Cout,)
    # (Cout,Cin,kh,kw) -> (kh,kw,Cin,Cout) -> (k*k*Cin, Cout); row order matches im2col.
    w_mat = jnp.transpose(conv_w, (2, 3, 1, 0)).reshape(k * k * Cin, Cout)
    w_folded = (w_mat * scale[None, :]).astype(compute_dtype)

    x_cols, Ho, Wo = _im2col_nhwc(x_nhwc, k, stride)
    y = _cbl_matmul(x_cols.astype(compute_dtype), w_folded, bias,
                    out_dtype=out_dtype, tm_req=tm)
    return y.reshape(N, Ho, Wo, Cout)


def cbl_forward(x_nchw, conv_w, bn_gamma, bn_beta, bn_mean, bn_var, **kw):
    """PyTorch-layout wrapper (NCHW in / NCHW out). Prefer cbl_forward_nhwc end-to-end
    in the surrounding model to avoid these two extra transpose passes over HBM."""
    x_nhwc = jnp.transpose(x_nchw, (0, 2, 3, 1))
    y = cbl_forward_nhwc(x_nhwc, conv_w, bn_gamma, bn_beta, bn_mean, bn_var, **kw)
    return jnp.transpose(y, (0, 3, 1, 2))


def _reference_nchw(x, w, gamma, beta, mean, var, stride, eps=1e-5):
    k = w.shape[-1]
    pad = k // 2
    y = jax.lax.conv_general_dilated(
        x, w, window_strides=(stride, stride),
        padding=((pad, pad), (pad, pad)),
        dimension_numbers=("NCHW", "OIHW", "NCHW"))
    scale = gamma / jnp.sqrt(var + eps)
    y = y * scale[None, :, None, None] + (beta - mean * scale)[None, :, None, None]
    return jnp.where(y >= 0, y, 0.1 * y)


if __name__ == "__main__":
    key = jax.random.PRNGKey(0)
    k_x, k_w3, k_w1, k_g, k_b, k_m, k_v = jax.random.split(key, 7)

    N, Cin, Cout, H, W = 2, 4, 8, 16, 16
    x = jax.random.normal(k_x, (N, Cin, H, W), dtype=jnp.float32)
    bn_gamma = 1.0 + 0.05 * jax.random.normal(k_g, (Cout,), dtype=jnp.float32)
    bn_beta = 0.05 * jax.random.normal(k_b, (Cout,), dtype=jnp.float32)
    bn_mean = 0.05 * jax.random.normal(k_m, (Cout,), dtype=jnp.float32)
    bn_var = jnp.abs(jax.random.normal(k_v, (Cout,), dtype=jnp.float32)) + 0.5

    # Tolerances accommodate TPU MXU default-precision matmul passes vs the XLA
    # reference conv; real bugs (tap ordering / padding / BN fold) give O(1) errors.

    # Case A: 3x3 conv, stride 1, f32 I/O (matches the PyTorch default CBL usage).
    w3 = 0.1 * jax.random.normal(k_w3, (Cout, Cin, 3, 3), dtype=jnp.float32)
    out_a = jax.block_until_ready(
        cbl_forward(x, w3, bn_gamma, bn_beta, bn_mean, bn_var, stride=1))
    ref_a = _reference_nchw(x, w3, bn_gamma, bn_beta, bn_mean, bn_var, 1)
    assert out_a.shape == (N, Cout, H, W), out_a.shape
    assert jnp.allclose(out_a, ref_a, atol=2e-2, rtol=2e-2)

    # Case B: 1x1 conv, stride 2, bf16 compute (halved input DMA bytes), f32 output.
    w1 = 0.1 * jax.random.normal(k_w1, (Cout, Cin, 1, 1), dtype=jnp.float32)
    out_b = jax.block_until_ready(
        cbl_forward(x, w1, bn_gamma, bn_beta, bn_mean, bn_var, stride=2,
                    compute_dtype=jnp.bfloat16, out_dtype=jnp.float32))
    ref_b = _reference_nchw(x, w1, bn_gamma, bn_beta, bn_mean, bn_var, 2)
    assert out_b.shape == (N, Cout, H // 2, W // 2), out_b.shape
    assert jnp.allclose(out_b, ref_b, atol=5e-2, rtol=5e-2)

    print("KERNEL_OK")
</pallas_src>

<mosaic_0001>
module attributes {stable_mosaic.version = 11 : i64} {
  func.func @_cbl_kernel(%arg0: i32, %arg1: memref<256x128xf32, #tpu.memory_space<vmem>>, %arg2: memref<128x128xf32, #tpu.memory_space<vmem>>, %arg3: memref<1x128xf32, #tpu.memory_space<vmem>>, %arg4: memref<256x128xf32, #tpu.memory_space<vmem>>) attributes {dimension_semantics = [#tpu.dimension_semantics<parallel>], iteration_bounds = array<i64: 2>, scalar_prefetch = 0 : i64, scratch_operands = 0 : i64, tpu.core_type = #tpu.core_type<tc>, window_params = [{transform_indices = @transform_0, window_bounds = array<i64: 256, 128>}, {pipeline_mode = #tpu.pipeline_mode<synchronous>, transform_indices = @transform_1, window_bounds = array<i64: 128, 128>}, {pipeline_mode = #tpu.pipeline_mode<synchronous>, transform_indices = @transform_2, window_bounds = array<i64: 1, 128>}, {transform_indices = @transform_3, window_bounds = array<i64: 256, 128>}]} {
    %c0 = arith.constant 0 : index
    %c0_0 = arith.constant 0 : index
    %0 = vector.load %arg1[%c0, %c0_0] : memref<256x128xf32, #tpu.memory_space<vmem>>, vector<256x128xf32>
    %c0_1 = arith.constant 0 : index
    %c0_2 = arith.constant 0 : index
    %1 = vector.load %arg2[%c0_1, %c0_2] : memref<128x128xf32, #tpu.memory_space<vmem>>, vector<128x128xf32>
    %cst = arith.constant dense<0.000000e+00> : vector<256x128xf32>
    %2 = tpu.matmul %0, %1, %cst {dimension_numbers = #tpu.dot_dimension_numbers<[1], [0], [0], [1], [0, 0, 1, 1], [], []>} : vector<256x128xf32>, vector<128x128xf32>, vector<256x128xf32> -> vector<256x128xf32>
    %c0_3 = arith.constant 0 : index
    %c0_4 = arith.constant 0 : index
    %3 = vector.load %arg3[%c0_3, %c0_4] : memref<1x128xf32, #tpu.memory_space<vmem>>, vector<1x128xf32>
    %4 = vector.broadcast %3 : vector<1x128xf32> to vector<256x128xf32>
    %5 = arith.addf %2, %4 : vector<256x128xf32>
    %cst_5 = arith.constant 0.000000e+00 : f32
    %6 = vector.broadcast %cst_5 : f32 to vector<256x128xf32>
    %7 = arith.cmpf oge, %5, %6 : vector<256x128xf32>
    %cst_6 = arith.constant 1.000000e-01 : f32
    %8 = vector.broadcast %cst_6 : f32 to vector<256x128xf32>
    %9 = arith.mulf %8, %5 : vector<256x128xf32>
    %10 = arith.select %7, %5, %9 : vector<256x128xi1>, vector<256x128xf32>
    %c0_7 = arith.constant 0 : index
    %c0_8 = arith.constant 0 : index
    %11 = vector.load %arg4[%c0_7, %c0_8] : memref<256x128xf32, #tpu.memory_space<vmem>>, vector<256x128xf32>
    tpu.vector_store %arg4[%c0_7, %c0_8], %10 {strides = array<i32>} : memref<256x128xf32, #tpu.memory_space<vmem>>, vector<256x128xf32>,
    return
  }
  func.func @transform_0(%arg0: i32) -> (i32, i32) {
    %c0_i32 = arith.constant 0 : i32
    %c0_i32_0 = arith.constant 0 : i32
    return %arg0, %c0_i32 : i32, i32
  }
  func.func @transform_1(%arg0: i32) -> (i32, i32) {
    %c0_i32 = arith.constant 0 : i32
    %c0_i32_0 = arith.constant 0 : i32
    %c0_i32_1 = arith.constant 0 : i32
    return %c0_i32, %c0_i32_0 : i32, i32
  }
  func.func @transform_2(%arg0: i32) -> (i32, i32) {
    %c0_i32 = arith.constant 0 : i32
    %c0_i32_0 = arith.constant 0 : i32
    %c0_i32_1 = arith.constant 0 : i32
    return %c0_i32, %c0_i32_0 : i32, i32
  }
  func.func @transform_3(%arg0: i32) -> (i32, i32) {
    %c0_i32 = arith.constant 0 : i32
    %c0_i32_0 = arith.constant 0 : i32
    return %arg0, %c0_i32 : i32, i32
  }
}

</mosaic_0001>

<bundles_post_ra>
// kernel: tpu_custom_call.1
= control target key start
LH: loop header
LB: loop body
LE: loop exit
PB: predicated region body
PF: predicated region fallthrough
CT: control target
= control target key end

     0   :  { %8 = vsyncpa [#allocation3], 0  ;;  %s1141_s0 = inlined_call_operand.hbm [shape: f32[512,128], index: 0, kind: input, shape index: {}]   ;;  %s1142_s1 = inlined_call_operand.hbm [shape: f32[128,128], index: 1, kind: input, shape index: {}]   ;;  %s1143_s2 = inlined_call_operand.vmem [shape: f32[1,128], index: 2, kind: input, shape index: {}]   ;;  %s1144_s3 = inlined_call_operand.hbm [shape: f32[512,128], index: 3, kind: output, shape index: {}]  }
   0x1   :  { %10 = vsyncpa [#allocation3 + $0x1], 0 }
   0x2   :  { %11 = vsyncpa [#allocation6], 0 }
   0x3   :  { %12 = vsyncpa [#allocation4], 0 }
   0x4   :  { %14 = vsyncpa [#allocation4 + $0x1], 0  ;;  %s887_s12 = smov 0   ;;  %s889_s13 = smov 0  }
   0x5   :  { %s891_s14 = smov 0   ;;  %s893_s15 = smov 0  }
   0x6 LB: > { %s908_s16 = sadd.s32 4294967295, %s860_s15   ;;  %s602_s17 = sadd.s32 4294967294, %s860_s15   ;;  %s860_s15 = sphi %s893_s15, %s1154_s15   ;;  %s856_s14 = sphi %s891_s14, %s1153_s14   ;;  %s852_s13 = sphi %s889_s13, %s1152_s13   ;;  %s848_s12 = sphi %s887_s12, %s1151_s12  }
   0x7   : > { %p40_p0 = scmp.ne.s32.totalorder %s852_s13, %s848_s12  ;;  %p41_p1 = scmp.eq.s32.totalorder %s908_s16, 0 }
   0x8   : > { %p106_p2 = scmp.eq.s32.totalorder %s908_s16, 1  ;;  %p112_p3 = scmp.eq.s32.totalorder %s602_s17, 1 }
   0x9   : > { %p917_p4 = por %p41_p1, %p40_p0  ;;  %p603_p5 = scmp.ge.s32.totalorder %s860_s15, 1 }
   0xa   : > { %p922_p6 = por %p112_p3, %p40_p0  ;;  %p119_p7 = scmp.lt.s32.totalorder %s860_s15, 3 }
   0xb   : > { %s130_s22 = sshll.u32 %s1142_s1, 4  ;;  %s862_s24 = smov [#allocation5]   ;;  %s131_s22 = int_to_ptr.hbm [resolvable:$true] %s130_s22 }
   0xc   : > { %p930_p8 = pnand %p603_p5, %p119_p7  ;;  %s132_s25 = sshll.u32 %s862_s24, 4  ;;  %s133_s25 = int_to_ptr.vmem [resolvable:$true] %s132_s25 }
   0xd   : > { %s940_s26 = sadd.s32 1, %s860_s15   ;;  %s863_s27 = smov 128  }
   0xe   : > { %p676_p9 = pneg %p930_p8  ;;  %s864_s28 = smov 8  }
   0xf   : > { %s24_s29 = ssub.s32 %s860_s15, %s940_s26  ;;  %s27_s30 = sadd.s32 1, %s856_s14 }
  0x10   : > { %p677_p10 = pnand %p676_p9, %p41_p1  ;;  %p25_p12 = scmp.eq.s32.totalorder %s24_s29, 0 }
  0x11   : > { %p34_p13 = scmp.ne.s32.totalorder %s856_s14, %s852_s13  ;;  %p35_p0 = scmp.eq.s32.totalorder %s860_s15, 0 }
  0x12   : > { %679 = dma.hbm_to_vmem [thread:$0]  (!%p677_p10), %s131_s22, 2048, %s133_s25, [#allocation6], %s863_s27, %s863_s27, %s864_s28  }
  0x13   : > { %s952_s4 = scalar_select %p25_p12, %s856_s14, %s27_s30  }
  0x14   : > { %p956_p3 = por %p106_p2, %p34_p13  ;;  %p689_p5 = scmp.lt.s32.totalorder %s860_s15, 2 }
  0x15   : > { %s149_s6 = sand.u32 1, %s856_s14   ;;  %s618_s7 = sshll.u32 %s860_s15, 8 }
  0x16   : > { %p36_p7 = por %p35_p0, %p34_p13  ;;  %s606_s8 = sshll.u32 %s149_s6, 8 }
  0x17   : > { %s158_s11 = scalar_lea.hbm %s1141_s0, %s618_s7  ;;  %s153_s20 = scalar_lea.vmem [#allocation2], %s606_s8 }
  0x18   : > { %s159_s17 = sshll.u32 %s158_s11, 4  ;;  %s161_s21 = sshll.u32 %s153_s20, 4  ;;  %s160_s17 = int_to_ptr.hbm [resolvable:$true] %s159_s17  ;;  %s162_s21 = int_to_ptr.vmem [resolvable:$true] %s161_s21 }
  0x19   : > { %p966_p9 = pnand %p689_p5, %p36_p7  ;;  %s150_s24 = scalar_lea.sflag [#allocation3], %s149_s6 }
  0x1a   : > { %s760_s25 = sshra.s32 %s160_s17, 4  ;;  %s767_s8 = scalar_lea.hbm %s1141_s0, 512  ;;  %s761_s25 = int_to_ptr.hbm [resolvable:$true] %s760_s25 }
  0x1b   : > { %s762_s29 = scalar_lea.hbm %s761_s25, 256  ;;  %p764_p10 = pneg %p966_p9 }
  0x1c   : > { %p763_p2 = scmp.ne.s32.totalorder %s761_s25, %s762_s29  ;;  %p768_p0 = scmp.lt.s32.totalorder %s761_s25, %s1141_s0 }
  0x1d   : > { %p769_p5 = scmp.lt.s32.totalorder %s767_s8, %s762_s29 }
  0x1e   : > { %p765_p12 = pnand %p764_p10, %p763_p2 }
  0x1f   : > { %p770_p7 = por %p769_p5, %p768_p0 }
  0x20   : > { %p766_p13 = pneg %p765_p12 }
  0x22   : > { %p771_p11 = pnand %p770_p7, %p766_p13 }
  0x24   : > { %774 = shalt.err (!%p771_p11)
}
  0x25   : > { %683 = dma.hbm_to_vmem [thread:$0]  (!%p966_p9), %s160_s17, 4096, %s162_s21, %s150_s24, %s863_s27, %s863_s27, %s864_s28  }
  0x26   : > { %173 = sbr.rel (%p930_p8) target bundleno = 276 (0x114), region = 32  ;;  %s986_s6 = sand.u32 (!%p930_p8), 1, %s852_s13  }
  0x27   : > { %s610_s11 = sshll.u32 (!%p930_p8), %s986_s6, 8  ;;  %s176_s20 = scalar_lea.sflag (!%p930_p8), [#allocation3], %s986_s6 }
  0x28   : > { %s992_s25 = scalar_lea.vmem (!%p930_p8), [#allocation2], %s610_s11 }
  0x2b   : > { %835 = dma.done.wait (%p917_p4), %s176_s20, 4096  }
  0x2c   : > { %837 = vsyncadd (%p917_p4), %s176_s20, 4294963200 }
  0x2d   : > { %839 = dma.done.wait (%p41_p1), [#allocation6], 2048  }
  0x2e   : > { %841 = vsyncadd (%p41_p1), [#allocation6], 4294965248  ;;  %v257_v0 = vld [vmem:[#allocation5 + $0x78] sm:$0xff]  ;;  %v256_v1 = vld [vmem:[#allocation5 + $0x70] sm:$0xff]  ;;  %s1045_s27 = scalar_lea.vmem [#allocation7], %s610_s11  ;;  %s619_s28 = sshll.u32 %s908_s16, 8 }
  0x2f   : > { %621 = vmatpush.msra.mxu2 %v257_v0  ;;  %622 = vmatpush.msra.mxu3 %v257_v0  ;;  %v255_v2 = vld [vmem:[#allocation5 + $0x68] sm:$0xff]  ;;  %v254_v3 = vld [vmem:[#allocation5 + $0x60] sm:$0xff]  ;;  %v253_v4 = vld [vmem:[#allocation5 + $0x58] sm:$0xff]  ;;  %s515_s22 = scalar_lea.hbm %s1144_s3, %s619_s28  ;;  %s516_s16 = sshll.u32 %s1045_s27, 4  ;;  %s517_s16 = int_to_ptr.vmem [resolvable:$true] %s516_s16 }
  0x30   : > { %262 = vmatpush.msra.mxu0 %v257_v0  ;;  %620 = vmatpush.msra.mxu1 %v257_v0  ;;  %v252_v5 = vld [vmem:[#allocation5 + $0x50] sm:$0xff]  ;;  %v251_v6 = vld [vmem:[#allocation5 + $0x48] sm:$0xff]  ;;  %v250_v7 = vld [vmem:[#allocation5 + $0x40] sm:$0xff]  ;;  %s518_s24 = sshll.u32 %s515_s22, 4  ;;  %s504_s29 = scalar_lea.sflag [#allocation4], %s986_s6  ;;  %s519_s24 = int_to_ptr.hbm [resolvable:$true] %s518_s24 }
  0x31   : > { %624 = vmatpush.msra.mxu2 %v256_v1  ;;  %625 = vmatpush.msra.mxu3 %v256_v1  ;;  %v249_v8 = vld [vmem:[#allocation5 + $0x38] sm:$0xff]  ;;  %v248_v9 = vld [vmem:[#allocation5 + $0x30] sm:$0xff]  ;;  %v247_v10 = vld [vmem:[#allocation5 + $0x28] sm:$0xff]  ;;  %s804_s30 = sshra.s32 %s519_s24, 4  ;;  %s810_s10 = scalar_lea.hbm %s1144_s3, 512  ;;  %s805_s30 = int_to_ptr.hbm [resolvable:$true] %s804_s30 }
  0x32   : > { %263 = vmatpush.msra.mxu0 %v256_v1  ;;  %623 = vmatpush.msra.mxu1 %v256_v1  ;;  %v246_v11 = vld [vmem:[#allocation5 + $0x20] sm:$0xff]  ;;  %v245_v12 = vld [vmem:[#allocation5 + $0x18] sm:$0xff]  ;;  %v244_v13 = vld [vmem:[#allocation5 + $0x10] sm:$0xff]  ;;  %s806_s7 = scalar_lea.hbm %s805_s30, 256  ;;  %p811_p11 = scmp.lt.s32.totalorder %s805_s30, %s1144_s3 }
  0x33   : > { %627 = vmatpush.msra.mxu2 %v255_v2  ;;  %628 = vmatpush.msra.mxu3 %v255_v2  ;;  %v243_v14 = vld [vmem:[#allocation5 + $0x8] sm:$0xff]  ;;  %v242_v15 = vld [vmem:[#allocation5] sm:$0xff]  ;;  %v228_v24 = vld [vmem:[%s992_s25 + $0x90] sm:$0xff]  ;;  %p807_p1 = scmp.ne.s32.totalorder %s805_s30, %s806_s7  ;;  %p812_p9 = scmp.lt.s32.totalorder %s810_s10, %s806_s7 }
  0x34   : > { %264 = vmatpush.msra.mxu0 %v255_v2  ;;  %626 = vmatpush.msra.mxu1 %v255_v2  ;;  %v226_v16 = vld [vmem:[%s992_s25 + $0x80] sm:$0xff]  ;;  %v227_v20 = vld [vmem:[%s992_s25 + $0x88] sm:$0xff]  ;;  %v236_v25 = vld [vmem:[%s992_s25 + $0xd0] sm:$0xff] }
  0x35   : > { %630 = vmatpush.msra.mxu2 %v254_v3  ;;  %631 = vmatpush.msra.mxu3 %v254_v3  ;;  %v234_v17 = vld [vmem:[%s992_s25 + $0xc0] sm:$0xff]  ;;  %v235_v21 = vld [vmem:[%s992_s25 + $0xc8] sm:$0xff]  ;;  %v212_v26 = vld [vmem:[%s992_s25 + $0x10] sm:$0xff]  ;;  %p808_p4 = pnand %p807_p1, %p956_p3  ;;  %p813_p2 = por %p812_p9, %p811_p11 }
  0x36   : > { %265 = vmatpush.msra.mxu0 %v254_v3  ;;  %629 = vmatpush.msra.mxu1 %v254_v3  ;;  %v210_v18 = vld [vmem:[%s992_s25] sm:$0xff]  ;;  %v211_v22 = vld [vmem:[%s992_s25 + $0x8] sm:$0xff]  ;;  %v220_v27 = vld [vmem:[%s992_s25 + $0x50] sm:$0xff] }
  0x37   : > { %633 = vmatpush.msra.mxu2 %v253_v4  ;;  %634 = vmatpush.msra.mxu3 %v253_v4  ;;  %v218_v19 = vld [vmem:[%s992_s25 + $0x40] sm:$0xff]  ;;  %v219_v23 = vld [vmem:[%s992_s25 + $0x48] sm:$0xff]  ;;  %v229_v28 = vld [vmem:[%s992_s25 + $0x98] sm:$0xff]  ;;  %p809_p8 = pneg %p808_p4 }
  0x38   : > { %266 = vmatpush.msra.mxu0 %v253_v4  ;;  %632 = vmatpush.msra.mxu1 %v253_v4  ;;  %v237_v29 = vld [vmem:[%s992_s25 + $0xd8] sm:$0xff]  ;;  %v230_v32 = vld [vmem:[%s992_s25 + $0xa0] sm:$0xff]  ;;  %v231_v36 = vld [vmem:[%s992_s25 + $0xa8] sm:$0xff] }
  0x39   : > { %636 = vmatpush.msra.mxu2 %v252_v5  ;;  %637 = vmatpush.msra.mxu3 %v252_v5  ;;  %v213_v30 = vld [vmem:[%s992_s25 + $0x18] sm:$0xff]  ;;  %v238_v33 = vld [vmem:[%s992_s25 + $0xe0] sm:$0xff]  ;;  %v239_v37 = vld [vmem:[%s992_s25 + $0xe8] sm:$0xff]  ;;  %p814_p10 = pnand %p813_p2, %p809_p8 }
  0x3a   : > { %267 = vmatpush.msra.mxu0 %v252_v5  ;;  %635 = vmatpush.msra.mxu1 %v252_v5  ;;  %v221_v31 = vld [vmem:[%s992_s25 + $0x58] sm:$0xff]  ;;  %v214_v34 = vld [vmem:[%s992_s25 + $0x20] sm:$0xff]  ;;  %v215_v38 = vld [vmem:[%s992_s25 + $0x28] sm:$0xff] }
  0x3b   : > { %639 = vmatpush.msra.mxu2 %v251_v6  ;;  %640 = vmatpush.msra.mxu3 %v251_v6  ;;  %v222_v35 = vld [vmem:[%s992_s25 + $0x60] sm:$0xff]  ;;  %v223_v39 = vld [vmem:[%s992_s25 + $0x68] sm:$0xff]  ;;  %v232_v40 = vld [vmem:[%s992_s25 + $0xb0] sm:$0xff] }
  0x3c   : > { %268 = vmatpush.msra.mxu0 %v251_v6  ;;  %638 = vmatpush.msra.mxu1 %v251_v6  ;;  %v240_v41 = vld [vmem:[%s992_s25 + $0xf0] sm:$0xff]  ;;  %v233_v44 = vld [vmem:[%s992_s25 + $0xb8] sm:$0xff]  ;;  %v1037_v48 = vld [vmem:[%s1143_s2] ss:$0 sm:$0xff] }
  0x3d   : > { %642 = vmatpush.msra.mxu2 %v250_v7  ;;  %643 = vmatpush.msra.mxu3 %v250_v7  ;;  %v216_v42 = vld [vmem:[%s992_s25 + $0x30] sm:$0xff]  ;;  %v241_v45 = vld [vmem:[%s992_s25 + $0xf8] sm:$0xff] }
  0x3e   : > { %269 = vmatpush.msra.mxu0 %v250_v7  ;;  %641 = vmatpush.msra.mxu1 %v250_v7  ;;  %v224_v43 = vld [vmem:[%s992_s25 + $0x70] sm:$0xff]  ;;  %v217_v46 = vld [vmem:[%s992_s25 + $0x38] sm:$0xff] }
  0x3f   : > { %645 = vmatpush.msra.mxu2 %v249_v8  ;;  %646 = vmatpush.msra.mxu3 %v249_v8  ;;  %v225_v47 = vld [vmem:[%s992_s25 + $0x78] sm:$0xff] }
  0x40   : > { %270 = vmatpush.msra.mxu0 %v249_v8  ;;  %644 = vmatpush.msra.mxu1 %v249_v8 }
  0x41   : > { %648 = vmatpush.msra.mxu2 %v248_v9  ;;  %649 = vmatpush.msra.mxu3 %v248_v9 }
  0x42   : > { %271 = vmatpush.msra.mxu0 %v248_v9  ;;  %647 = vmatpush.msra.mxu1 %v248_v9 }
  0x43   : > { %651 = vmatpush.msra.mxu2 %v247_v10  ;;  %652 = vmatpush.msra.mxu3 %v247_v10 }
  0x44   : > { %272 = vmatpush.msra.mxu0 %v247_v10  ;;  %650 = vmatpush.msra.mxu1 %v247_v10 }
  0x45   : > { %654 = vmatpush.msra.mxu2 %v246_v11  ;;  %655 = vmatpush.msra.mxu3 %v246_v11 }
  0x46   : > { %273 = vmatpush.msra.mxu0 %v246_v11  ;;  %653 = vmatpush.msra.mxu1 %v246_v11 }
  0x47   : > { %657 = vmatpush.msra.mxu2 %v245_v12  ;;  %658 = vmatpush.msra.mxu3 %v245_v12 }
  0x48   : > { %274 = vmatpush.msra.mxu0 %v245_v12  ;;  %656 = vmatpush.msra.mxu1 %v245_v12 }
  0x49   : > { %660 = vmatpush.msra.mxu2 %v244_v13  ;;  %661 = vmatpush.msra.mxu3 %v244_v13 }
  0x4a   : > { %275 = vmatpush.msra.mxu0 %v244_v13  ;;  %659 = vmatpush.msra.mxu1 %v244_v13 }
  0x4b   : > { %663 = vmatpush.msra.mxu2 %v243_v14  ;;  %664 = vmatpush.msra.mxu3 %v243_v14 }
  0x4c   : > { %276 = vmatpush.msra.mxu0 %v243_v14  ;;  %662 = vmatpush.msra.mxu1 %v243_v14 }
  0x4d   : > { %666 = vmatpush.msra.mxu2 %v242_v15  ;;  %667 = vmatpush.msra.mxu3 %v242_v15 }
  0x4e   : > { %326 = vmatmul.f32.vlgmr.msra.gmra.mxu2 %v226_v16  ;;  %350 = vmatmul.f32.vlgmr.msra.gmra.mxu3 %v234_v17 }
  0x4f   : > { %277 = vmatpush.msra.mxu0 %v242_v15  ;;  %665 = vmatpush.msra.mxu1 %v242_v15 }
  0x50   : > { %278 = vmatmul.f32.vlgmr.msra.gmra.mxu0 %v210_v18  ;;  %302 = vmatmul.f32.vlgmr.msra.gmra.mxu1 %v218_v19 }
  0x56   : > { %329 = vmatmul.f32.gmra.mxu2 %v227_v20  ;;  %353 = vmatmul.f32.gmra.mxu3 %v235_v21 }
  0x58   : > { %281 = vmatmul.f32.gmra.mxu0 %v211_v22  ;;  %305 = vmatmul.f32.gmra.mxu1 %v219_v23 }
  0x5e   : > { %332 = vmatmul.f32.gmra.mxu2 %v228_v24  ;;  %356 = vmatmul.f32.gmra.mxu3 %v236_v25 }
  0x60   : > { %284 = vmatmul.f32.gmra.mxu0 %v212_v26  ;;  %308 = vmatmul.f32.gmra.mxu1 %v220_v27 }
  0x66   : > { %335 = vmatmul.f32.gmra.mxu2 %v229_v28  ;;  %359 = vmatmul.f32.gmra.mxu3 %v237_v29 }
  0x68   : > { %287 = vmatmul.f32.gmra.mxu0 %v213_v30  ;;  %311 = vmatmul.f32.gmra.mxu1 %v221_v31 }
  0x6e   : > { %338 = vmatmul.f32.gmra.mxu2 %v230_v32  ;;  %362 = vmatmul.f32.gmra.mxu3 %v238_v33 }
  0x70   : > { %290 = vmatmul.f32.gmra.mxu0 %v214_v34  ;;  %314 = vmatmul.f32.gmra.mxu1 %v222_v35 }
  0x76   : > { %341 = vmatmul.f32.gmra.mxu2 %v231_v36  ;;  %365 = vmatmul.f32.gmra.mxu3 %v239_v37 }
  0x78   : > { %293 = vmatmul.f32.gmra.mxu0 %v215_v38  ;;  %317 = vmatmul.f32.gmra.mxu1 %v223_v39 }
  0x7e   : > { %344 = vmatmul.f32.gmra.mxu2 %v232_v40  ;;  %368 = vmatmul.f32.gmra.mxu3 %v240_v41 }
  0x80   : > { %296 = vmatmul.f32.gmra.mxu0 %v216_v42  ;;  %320 = vmatmul.f32.gmra.mxu1 %v224_v43 }
  0x86   : > { %347 = vmatmul.f32.gmra.mxu2 %v233_v44  ;;  %371 = vmatmul.f32.gmra.mxu3 %v241_v45 }
  0x88   : > { %299 = vmatmul.f32.gmra.mxu0 %v217_v46  ;;  %323 = vmatmul.f32.gmra.mxu1 %v225_v47 }
  0xcd   : > { %v279_v49 = vpop.f32.mrf.mxu0  ;;  %v303_v50 = vpop.f32.mrf.mxu1 }
  0xce   : > { %v280_v51 = vadd.f32 %v1037_v48, %v279_v49  ;;  %v304_v52 = vadd.f32 %v1037_v48, %v303_v50 }
  0xd0   : > { %vm375_vm0 = vcmp.ge.f32.partialorder %v280_v51, 0.0  ;;  %v407_v53 = vmul.f32 0.1, %v280_v51  ;;  %vm383_vm1 = vcmp.ge.f32.partialorder %v304_v52, 0.0  ;;  %v415_v54 = vmul.f32 0.1, %v304_v52 }
  0xd1   : > { %v327_v55 = vpop.f32.mrf.mxu2  ;;  %v351_v56 = vpop.f32.mrf.mxu3 }
  0xd2   : > { %v439_v57 = vsel %vm375_vm0, %v280_v51, %v407_v53  ;;  %v447_v58 = vsel %vm383_vm1, %v304_v52, %v415_v54  ;;  %v328_v59 = vadd.f32 %v1037_v48, %v327_v55  ;;  %v352_v60 = vadd.f32 %v1037_v48, %v351_v56 }
  0xd3   : > { %471 = vst [vmem:[%s1045_s27] sm:$0xff] %v439_v57 }
  0xd4   : > { %479 = vst [vmem:[%s1045_s27 + $0x40] sm:$0xff] %v447_v58  ;;  %vm391_vm2 = vcmp.ge.f32.partialorder %v328_v59, 0.0  ;;  %v423_v61 = vmul.f32 0.1, %v328_v59  ;;  %vm399_vm3 = vcmp.ge.f32.partialorder %v352_v60, 0.0 }
  0xd5   : > { %v431_v62 = vmul.f32 0.1, %v352_v60  ;;  %v282_v63 = vpop.f32.mrf.mxu0  ;;  %v306_v0 = vpop.f32.mrf.mxu1 }
  0xd6   : > { %v455_v1 = vsel %vm391_vm2, %v328_v59, %v423_v61  ;;  %v283_v2 = vadd.f32 %v1037_v48, %v282_v63  ;;  %v307_v3 = vadd.f32 %v1037_v48, %v306_v0 }
  0xd7   : > { %487 = vst [vmem:[%s1045_s27 + $0x80] sm:$0xff] %v455_v1  ;;  %v463_v4 = vsel %vm399_vm3, %v352_v60, %v431_v62 }
  0xd8   : > { %495 = vst [vmem:[%s1045_s27 + $0xc0] sm:$0xff] %v463_v4  ;;  %vm376_vm4 = vcmp.ge.f32.partialorder %v283_v2, 0.0  ;;  %v408_v5 = vmul.f32 0.1, %v283_v2  ;;  %vm384_vm5 = vcmp.ge.f32.partialorder %v307_v3, 0.0 }
  0xd9   : > { %v416_v6 = vmul.f32 0.1, %v307_v3  ;;  %v330_v7 = vpop.f32.mrf.mxu2  ;;  %v354_v8 = vpop.f32.mrf.mxu3 }
  0xda   : > { %v440_v9 = vsel %vm376_vm4, %v283_v2, %v408_v5  ;;  %v331_v10 = vadd.f32 %v1037_v48, %v330_v7  ;;  %v355_v11 = vadd.f32 %v1037_v48, %v354_v8 }
  0xdb   : > { %472 = vst [vmem:[%s1045_s27 + $0x8] sm:$0xff] %v440_v9  ;;  %v448_v12 = vsel %vm384_vm5, %v307_v3, %v416_v6 }
  0xdc   : > { %480 = vst [vmem:[%s1045_s27 + $0x48] sm:$0xff] %v448_v12  ;;  %vm392_vm6 = vcmp.ge.f32.partialorder %v331_v10, 0.0  ;;  %v424_v13 = vmul.f32 0.1, %v331_v10  ;;  %vm400_vm7 = vcmp.ge.f32.partialorder %v355_v11, 0.0 }
  0xdd   : > { %v432_v14 = vmul.f32 0.1, %v355_v11  ;;  %v285_v15 = vpop.f32.mrf.mxu0  ;;  %v309_v16 = vpop.f32.mrf.mxu1 }
  0xde   : > { %v456_v17 = vsel %vm392_vm6, %v331_v10, %v424_v13  ;;  %v286_v18 = vadd.f32 %v1037_v48, %v285_v15  ;;  %v310_v19 = vadd.f32 %v1037_v48, %v309_v16 }
  0xdf   : > { %488 = vst [vmem:[%s1045_s27 + $0x88] sm:$0xff] %v456_v17  ;;  %v464_v20 = vsel %vm400_vm7, %v355_v11, %v432_v14 }
  0xe0   : > { %496 = vst [vmem:[%s1045_s27 + $0xc8] sm:$0xff] %v464_v20  ;;  %vm377_vm8 = vcmp.ge.f32.partialorder %v286_v18, 0.0  ;;  %v409_v21 = vmul.f32 0.1, %v286_v18  ;;  %vm385_vm9 = vcmp.ge.f32.partialorder %v310_v19, 0.0 }
  0xe1   : > { %v417_v22 = vmul.f32 0.1, %v310_v19  ;;  %v333_v23 = vpop.f32.mrf.mxu2  ;;  %v357_v24 = vpop.f32.mrf.mxu3 }
  0xe2   : > { %v441_v25 = vsel %vm377_vm8, %v286_v18, %v409_v21  ;;  %v334_v26 = vadd.f32 %v1037_v48, %v333_v23  ;;  %v358_v27 = vadd.f32 %v1037_v48, %v357_v24 }
  0xe3   : > { %473 = vst [vmem:[%s1045_s27 + $0x10] sm:$0xff] %v441_v25  ;;  %v449_v28 = vsel %vm385_vm9, %v310_v19, %v417_v22 }
  0xe4   : > { %481 = vst [vmem:[%s1045_s27 + $0x50] sm:$0xff] %v449_v28  ;;  %vm393_vm10 = vcmp.ge.f32.partialorder %v334_v26, 0.0  ;;  %v425_v29 = vmul.f32 0.1, %v334_v26  ;;  %vm401_vm11 = vcmp.ge.f32.partialorder %v358_v27, 0.0 }
  0xe5   : > { %v433_v30 = vmul.f32 0.1, %v358_v27  ;;  %v288_v31 = vpop.f32.mrf.mxu0  ;;  %v312_v32 = vpop.f32.mrf.mxu1 }
  0xe6   : > { %v457_v33 = vsel %vm393_vm10, %v334_v26, %v425_v29  ;;  %v289_v34 = vadd.f32 %v1037_v48, %v288_v31  ;;  %v313_v35 = vadd.f32 %v1037_v48, %v312_v32 }
  0xe7   : > { %489 = vst [vmem:[%s1045_s27 + $0x90] sm:$0xff] %v457_v33  ;;  %v465_v36 = vsel %vm401_vm11, %v358_v27, %v433_v30 }
  0xe8   : > { %497 = vst [vmem:[%s1045_s27 + $0xd0] sm:$0xff] %v465_v36  ;;  %vm378_vm12 = vcmp.ge.f32.partialorder %v289_v34, 0.0  ;;  %v410_v37 = vmul.f32 0.1, %v289_v34  ;;  %vm386_vm13 = vcmp.ge.f32.partialorder %v313_v35, 0.0 }
  0xe9   : > { %v418_v38 = vmul.f32 0.1, %v313_v35  ;;  %v336_v39 = vpop.f32.mrf.mxu2  ;;  %v360_v40 = vpop.f32.mrf.mxu3 }
  0xea   : > { %v442_v41 = vsel %vm378_vm12, %v289_v34, %v410_v37  ;;  %v337_v42 = vadd.f32 %v1037_v48, %v336_v39  ;;  %v361_v43 = vadd.f32 %v1037_v48, %v360_v40 }
  0xeb   : > { %474 = vst [vmem:[%s1045_s27 + $0x18] sm:$0xff] %v442_v41  ;;  %v450_v44 = vsel %vm386_vm13, %v313_v35, %v418_v38 }
  0xec   : > { %482 = vst [vmem:[%s1045_s27 + $0x58] sm:$0xff] %v450_v44  ;;  %vm394_vm14 = vcmp.ge.f32.partialorder %v337_v42, 0.0  ;;  %v426_v45 = vmul.f32 0.1, %v337_v42  ;;  %vm402_vm15 = vcmp.ge.f32.partialorder %v361_v43, 0.0 }
  0xed   : > { %v434_v46 = vmul.f32 0.1, %v361_v43  ;;  %v291_v47 = vpop.f32.mrf.mxu0  ;;  %v315_v49 = vpop.f32.mrf.mxu1 }
  0xee   : > { %v458_v50 = vsel %vm394_vm14, %v337_v42, %v426_v45  ;;  %v292_v51 = vadd.f32 %v1037_v48, %v291_v47  ;;  %v316_v52 = vadd.f32 %v1037_v48, %v315_v49 }
  0xef   : > { %490 = vst [vmem:[%s1045_s27 + $0x98] sm:$0xff] %v458_v50  ;;  %v466_v53 = vsel %vm402_vm15, %v361_v43, %v434_v46 }
  0xf0   : > { %498 = vst [vmem:[%s1045_s27 + $0xd8] sm:$0xff] %v466_v53  ;;  %vm379_vm0 = vcmp.ge.f32.partialorder %v292_v51, 0.0  ;;  %v411_v54 = vmul.f32 0.1, %v292_v51  ;;  %vm387_vm1 = vcmp.ge.f32.partialorder %v316_v52, 0.0 }
  0xf1   : > { %v419_v55 = vmul.f32 0.1, %v316_v52  ;;  %v339_v56 = vpop.f32.mrf.mxu2  ;;  %v363_v57 = vpop.f32.mrf.mxu3 }
  0xf2   : > { %v443_v58 = vsel %vm379_vm0, %v292_v51, %v411_v54  ;;  %v340_v59 = vadd.f32 %v1037_v48, %v339_v56  ;;  %v364_v60 = vadd.f32 %v1037_v48, %v363_v57 }
  0xf3   : > { %475 = vst [vmem:[%s1045_s27 + $0x20] sm:$0xff] %v443_v58  ;;  %v451_v61 = vsel %vm387_vm1, %v316_v52, %v419_v55 }
  0xf4   : > { %483 = vst [vmem:[%s1045_s27 + $0x60] sm:$0xff] %v451_v61  ;;  %vm395_vm2 = vcmp.ge.f32.partialorder %v340_v59, 0.0  ;;  %v427_v62 = vmul.f32 0.1, %v340_v59  ;;  %vm403_vm3 = vcmp.ge.f32.partialorder %v364_v60, 0.0 }
  0xf5   : > { %v435_v63 = vmul.f32 0.1, %v364_v60  ;;  %v294_v0 = vpop.f32.mrf.mxu0  ;;  %v318_v1 = vpop.f32.mrf.mxu1 }
  0xf6   : > { %v459_v2 = vsel %vm395_vm2, %v340_v59, %v427_v62  ;;  %v295_v3 = vadd.f32 %v1037_v48, %v294_v0  ;;  %v319_v4 = vadd.f32 %v1037_v48, %v318_v1 }
  0xf7   : > { %491 = vst [vmem:[%s1045_s27 + $0xa0] sm:$0xff] %v459_v2  ;;  %v467_v5 = vsel %vm403_vm3, %v364_v60, %v435_v63 }
  0xf8   : > { %499 = vst [vmem:[%s1045_s27 + $0xe0] sm:$0xff] %v467_v5  ;;  %vm380_vm4 = vcmp.ge.f32.partialorder %v295_v3, 0.0  ;;  %v412_v6 = vmul.f32 0.1, %v295_v3  ;;  %vm388_vm5 = vcmp.ge.f32.partialorder %v319_v4, 0.0 }
  0xf9   : > { %v420_v7 = vmul.f32 0.1, %v319_v4  ;;  %v342_v8 = vpop.f32.mrf.mxu2  ;;  %v366_v9 = vpop.f32.mrf.mxu3 }
  0xfa   : > { %v444_v10 = vsel %vm380_vm4, %v295_v3, %v412_v6  ;;  %v343_v11 = vadd.f32 %v1037_v48, %v342_v8  ;;  %v367_v12 = vadd.f32 %v1037_v48, %v366_v9 }
  0xfb   : > { %476 = vst [vmem:[%s1045_s27 + $0x28] sm:$0xff] %v444_v10  ;;  %v452_v13 = vsel %vm388_vm5, %v319_v4, %v420_v7 }
  0xfc   : > { %484 = vst [vmem:[%s1045_s27 + $0x68] sm:$0xff] %v452_v13  ;;  %vm396_vm6 = vcmp.ge.f32.partialorder %v343_v11, 0.0  ;;  %v428_v14 = vmul.f32 0.1, %v343_v11  ;;  %vm404_vm7 = vcmp.ge.f32.partialorder %v367_v12, 0.0 }
  0xfd   : > { %v436_v15 = vmul.f32 0.1, %v367_v12  ;;  %v297_v16 = vpop.f32.mrf.mxu0  ;;  %v321_v17 = vpop.f32.mrf.mxu1 }
  0xfe   : > { %v460_v18 = vsel %vm396_vm6, %v343_v11, %v428_v14  ;;  %v298_v19 = vadd.f32 %v1037_v48, %v297_v16  ;;  %v322_v20 = vadd.f32 %v1037_v48, %v321_v17 }
  0xff   : > { %492 = vst [vmem:[%s1045_s27 + $0xa8] sm:$0xff] %v460_v18  ;;  %v468_v21 = vsel %vm404_vm7, %v367_v12, %v436_v15 }
 0x100   : > { %500 = vst [vmem:[%s1045_s27 + $0xe8] sm:$0xff] %v468_v21  ;;  %vm381_vm8 = vcmp.ge.f32.partialorder %v298_v19, 0.0  ;;  %v413_v22 = vmul.f32 0.1, %v298_v19  ;;  %vm389_vm9 = vcmp.ge.f32.partialorder %v322_v20, 0.0 }
 0x101   : > { %v421_v23 = vmul.f32 0.1, %v322_v20  ;;  %v345_v24 = vpop.f32.mrf.mxu2  ;;  %v369_v25 = vpop.f32.mrf.mxu3 }
 0x102   : > { %v445_v26 = vsel %vm381_vm8, %v298_v19, %v413_v22  ;;  %v346_v27 = vadd.f32 %v1037_v48, %v345_v24  ;;  %v370_v28 = vadd.f32 %v1037_v48, %v369_v25 }
 0x103   : > { %477 = vst [vmem:[%s1045_s27 + $0x30] sm:$0xff] %v445_v26  ;;  %v453_v29 = vsel %vm389_vm9, %v322_v20, %v421_v23 }
 0x104   : > { %485 = vst [vmem:[%s1045_s27 + $0x70] sm:$0xff] %v453_v29  ;;  %vm397_vm10 = vcmp.ge.f32.partialorder %v346_v27, 0.0  ;;  %v429_v30 = vmul.f32 0.1, %v346_v27  ;;  %vm405_vm11 = vcmp.ge.f32.partialorder %v370_v28, 0.0 }
 0x105   : > { %v437_v31 = vmul.f32 0.1, %v370_v28  ;;  %v300_v32 = vpop.f32.mrf.mxu0  ;;  %v324_v33 = vpop.f32.mrf.mxu1 }
 0x106   : > { %v461_v34 = vsel %vm397_vm10, %v346_v27, %v429_v30  ;;  %v301_v35 = vadd.f32 %v1037_v48, %v300_v32  ;;  %v325_v36 = vadd.f32 %v1037_v48, %v324_v33 }
 0x107   : > { %493 = vst [vmem:[%s1045_s27 + $0xb0] sm:$0xff] %v461_v34  ;;  %v469_v37 = vsel %vm405_vm11, %v370_v28, %v437_v31 }
 0x108   : > { %501 = vst [vmem:[%s1045_s27 + $0xf0] sm:$0xff] %v469_v37  ;;  %vm382_vm12 = vcmp.ge.f32.partialorder %v301_v35, 0.0  ;;  %v414_v38 = vmul.f32 0.1, %v301_v35  ;;  %vm390_vm13 = vcmp.ge.f32.partialorder %v325_v36, 0.0 }
 0x109   : > { %v422_v39 = vmul.f32 0.1, %v325_v36  ;;  %v348_v40 = vpop.f32.mrf.mxu2  ;;  %v372_v41 = vpop.f32.mrf.mxu3 }
 0x10a   : > { %v446_v42 = vsel %vm382_vm12, %v301_v35, %v414_v38  ;;  %v349_v43 = vadd.f32 %v1037_v48, %v348_v40  ;;  %v373_v44 = vadd.f32 %v1037_v48, %v372_v41 }
 0x10b   : > { %478 = vst [vmem:[%s1045_s27 + $0x38] sm:$0xff] %v446_v42  ;;  %v454_v45 = vsel %vm390_vm13, %v325_v36, %v422_v39 }
 0x10c   : > { %486 = vst [vmem:[%s1045_s27 + $0x78] sm:$0xff] %v454_v45  ;;  %vm398_vm14 = vcmp.ge.f32.partialorder %v349_v43, 0.0  ;;  %v430_v46 = vmul.f32 0.1, %v349_v43  ;;  %vm406_vm15 = vcmp.ge.f32.partialorder %v373_v44, 0.0 }
 0x10d   : > { %v438_v47 = vmul.f32 0.1, %v373_v44 }
 0x10e   : > { %v462_v49 = vsel %vm398_vm14, %v349_v43, %v430_v46 }
 0x10f   : > { %494 = vst [vmem:[%s1045_s27 + $0xb8] sm:$0xff] %v462_v49  ;;  %v470_v50 = vsel %vm406_vm15, %v373_v44, %v438_v47 }
 0x110   : > { %502 = vst [vmem:[%s1045_s27 + $0xf8] sm:$0xff] %v470_v50 }
 0x111   : > { %817 = shalt.err (!%p814_p10)
}
 0x112   : > { %s865_s6 = smov 128   ;;  %s866_s25 = smov 8  }
 0x113   : > { %674 = dma.vmem_to_hbm [thread:$0]  (%p956_p3), %s517_s16, 4096, %s519_s24, %s504_s29, %s865_s6, %s865_s6, %s866_s25  }
 0x114 PF: > { %s533_s18 = sand.u32 1, %s848_s12   ;;  %p1150_p12 = scmp.ge.s32.totalorder %s860_s15, 2 }
 0x115   : > { %s534_s23 = scalar_lea.sflag [#allocation4], %s533_s18 }
 0x116   : > { %p685_p13 = pnand %p1150_p12, %p922_p6 }
 0x118   : > { %p686_p0 = pneg %p685_p13 }
 0x11a   : > { %843 = dma.done.wait (%p686_p0), %s534_s23, 4096  }
 0x11b   : > { %845 = vsyncadd (%p686_p0), %s534_s23, 4294963200  ;;  %p17_p5 = scmp.ge.s32.totalorder %s940_s26, 4   ;;  %s1151_s12 = smov %s852_s13 }
 0x11c   : > { %s1152_s13 = smov %s856_s14  ;;  %s1153_s14 = smov %s952_s4 }
 0x11d   : > { %s1154_s15 = smov %s940_s26  ;;  %19 = sbr.rel (!%p17_p5) target bundleno = 6 (0x6), region = 81 }
 0x122   :  { %540 = vsyncpa [#allocation3], 1 }
 0x123   :  { %542 = vsyncpa [#allocation3 + $0x1], 1 }
 0x124   :  { %543 = vsyncpa [#allocation6], 1 }
 0x125   :  { %544 = vsyncpa [#allocation4], 1 }
 0x126   :  { %546 = vsyncpa [#allocation4 + $0x1], 1 }

</bundles_post_ra>
